<compile_context>
chip_gen: v6e
topology: v6e:2x2x1
jax: 0.10.0
libtpu: 0.0.40
codegen_flags: <defaults>
</compile_context>

<pallas_src>
import jax
import jax.numpy as jnp
from jax.experimental import pallas as pl
from jax.experimental.pallas import tpu as pltpu


def _round_up(x, m):
    return (x + m - 1) // m * m


def _make_mlp_max_gate_kernel(n_parts):
    """Build the kernel for `n_parts` un-concatenated input tensors."""

    def kernel(*refs):
        x_refs = refs[:n_parts]                       # each (TB, D_p), float
        w1_refs = refs[n_parts:2 * n_parts]           # each (D_p, H), bf16
        b1_ref, w2_ref, sc_ref, o_ref = refs[2 * n_parts:]

        # ---- Layer 1: fused concat as a sum of per-part matmuls.
        # bf16 MXU inputs (in-register cast), f32 accumulation.
        acc = jnp.dot(x_refs[0][...].astype(jnp.bfloat16), w1_refs[0][...],
                      preferred_element_type=jnp.float32)
        for p in range(1, n_parts):
            acc = acc + jnp.dot(x_refs[p][...].astype(jnp.bfloat16),
                                w1_refs[p][...],
                                preferred_element_type=jnp.float32)
        h = jnp.tanh(acc + b1_ref[...])               # (TB, H) f32, tanh -> EUP

        # ---- Layer 2 (H -> 1) fused with the lane-dense output layout:
        # (1, H) . (TB, H)^T  ->  (1, TB), so the store is a full-lane vst.
        y = jax.lax.dot_general(
            w2_ref[...], h,
            dimension_numbers=(((1,), (1,)), ((), ())),
            preferred_element_type=jnp.float32)       # (1, TB)

        b2 = sc_ref[0]          # layer-2 bias
        max_act = sc_ref[1]     # max_activation
        out_bias = sc_ref[2]    # the nn.Parameter(5.0) bias
        o_ref[...] = (jnp.tanh(y + b2) * max_act + out_bias).astype(o_ref.dtype)

    return kernel


def mlp_max_gate_pallas(x_parts, w1t_parts, b1, w2_row, scalars, *, tile_rows=512):
    """x_parts: list of (B, D_p); w1t_parts: list of (D_p, H) bf16;
    b1, w2_row: (1, H) f32; scalars: (3,) f32 = [b2, max_activation, out_bias].
    Returns (B,) f32."""
    n_parts = len(x_parts)
    B = x_parts[0].shape[0]
    H = b1.shape[1]

    # Batch tile: multiple of 128 (lane-dense output block), capped at tile_rows.
    TB = min(_round_up(tile_rows, 128), _round_up(B, 128))
    B_pad = _round_up(B, TB)
    num_tiles = B_pad // TB

    if B_pad != B:
        # TODO(synk): remainder handled by padding; an in-kernel masked tail
        # would avoid this copy for large non-multiple B.
        x_parts = [jnp.pad(x, ((0, B_pad - B), (0, 0))) for x in x_parts]

    in_specs = (
        # activation tiles: streamed / double-buffered along the batch grid
        [pl.BlockSpec((TB, x.shape[1]), lambda i: (i, 0)) for x in x_parts]
        # weight blocks: constant index_map -> resident in VMEM across the grid
        + [pl.BlockSpec(w.shape, lambda i: (0, 0)) for w in w1t_parts]
        + [pl.BlockSpec((1, H), lambda i: (0, 0)),     # b1 (resident)
           pl.BlockSpec((1, H), lambda i: (0, 0)),     # w2 row (resident)
           pl.BlockSpec(memory_space=pltpu.MemorySpace.SMEM)]  # scalars in SMEM
    )

    out2d = pl.pallas_call(
        _make_mlp_max_gate_kernel(n_parts),
        out_shape=jax.ShapeDtypeStruct((1, B_pad), jnp.float32),
        grid_spec=pl.GridSpec(
            grid=(num_tiles,),
            in_specs=in_specs,
            out_specs=pl.BlockSpec((1, TB), lambda i: (0, i)),  # lane-dense slab
        ),
        compiler_params=pltpu.CompilerParams(
            dimension_semantics=("parallel",),
            vmem_limit_bytes=32 * 1024 * 1024,
        ),
    )(*x_parts, *w1t_parts, b1, w2_row, scalars)

    return out2d[0, :B]


def weight_norm(v, g, eps=1e-12):
    # torch weight_norm(Linear) default dim=0: per-output-row L2 norm.
    norm = jnp.sqrt(jnp.sum(v * v, axis=1, keepdims=True))    # (out, 1)
    return g * v / jnp.maximum(norm, eps)


def init_mlp_max_gate_params(key, input_size, hidden_size, bias=True):
    k1, k2, k3, k4 = jax.random.split(key, 4)
    # Deterministic synthetic init (shapes match the torch module).
    v1 = jax.random.normal(k1, (hidden_size, input_size), jnp.float32) * 0.1
    g1 = jnp.sqrt(jnp.sum(v1 * v1, axis=1, keepdims=True))    # g init = ||v||
    b1 = jax.random.normal(k2, (hidden_size,), jnp.float32) * 0.1
    v2 = jax.random.normal(k3, (1, hidden_size), jnp.float32) * 0.1
    g2 = jnp.sqrt(jnp.sum(v2 * v2, axis=1, keepdims=True))
    b2 = (jax.random.normal(k4, (1,), jnp.float32) * 0.1 if bias
          else jnp.zeros((1,), jnp.float32))
    out_bias = jnp.float32(5.0)                               # nn.Parameter(5.0)
    return dict(v1=v1, g1=g1, b1=b1, v2=v2, g2=g2, b2=b2, out_bias=out_bias)


def mlp_max_gate_forward(params, *args, max_activation=10.0, tile_rows=512):
    """Equivalent of MLPMaxGate.forward(*args): returns shape (..., 1)."""
    lead = args[0].shape[:-1]
    x_parts = [a.reshape(-1, a.shape[-1]) for a in args]      # no concat: fused in-kernel

    # Weight-norm reparameterization + W1^T splitting is tiny parameter setup.
    w1 = weight_norm(params["v1"], params["g1"])              # (H, D_in)
    w2 = weight_norm(params["v2"], params["g2"])              # (1, H)
    H = w1.shape[0]
    w1t = jnp.transpose(w1).astype(jnp.bfloat16)              # (D_in, H) bf16 for MXU
    w1t_parts = []
    off = 0
    for a in args:
        d = a.shape[-1]
        w1t_parts.append(w1t[off:off + d, :])
        off += d

    b1 = params["b1"].reshape(1, H).astype(jnp.float32)
    w2_row = w2.reshape(1, H).astype(jnp.float32)
    scalars = jnp.stack([
        params["b2"].reshape(()),
        jnp.float32(max_activation),
        params["out_bias"],
    ]).astype(jnp.float32)                                    # (3,) -> SMEM

    out = mlp_max_gate_pallas(x_parts, w1t_parts, b1, w2_row, scalars,
                              tile_rows=tile_rows)            # (B,)
    return out.reshape(*lead, 1)


if __name__ == "__main__":
    key = jax.random.PRNGKey(0)
    k_params, k_a, k_b = jax.random.split(key, 3)

    # Two input tensors concatenated along the last dim, as the module does.
    batch, seq, d_a, d_b = 2, 8, 16, 16
    hidden = 32
    max_activation = 10.0
    input_size = d_a + d_b

    a = jax.random.normal(k_a, (batch, seq, d_a), jnp.float32)
    b = jax.random.normal(k_b, (batch, seq, d_b), jnp.float32)

    params = init_mlp_max_gate_params(k_params, input_size, hidden, bias=True)

    out = mlp_max_gate_forward(params, a, b, max_activation=max_activation)
    jax.block_until_ready(out)

    # Reference in plain JAX (same math; layer-1 operands rounded to bf16 to
    # match the MXU input precision used in the kernel).
    x = jnp.concatenate([a, b], axis=-1)
    w1 = weight_norm(params["v1"], params["g1"])
    w2 = weight_norm(params["v2"], params["g2"])
    xb = x.astype(jnp.bfloat16).astype(jnp.float32)
    w1b = w1.astype(jnp.bfloat16).astype(jnp.float32)
    h = jnp.tanh(xb @ w1b.T + params["b1"])
    z = jnp.tanh(h @ w2.T + params["b2"])
    ref = z * max_activation + params["out_bias"]

    assert out.shape == (batch, seq, 1), out.shape
    err = float(jnp.max(jnp.abs(out - ref)))
    assert err < 5e-3, err

    print("KERNEL_OK")
</pallas_src>

<mosaic_0001>
module attributes {stable_mosaic.version = 11 : i64} {
  func.func @kernel(%arg0: i32, %arg1: memref<128x16xf32, #tpu.memory_space<vmem>>, %arg2: memref<128x16xf32, #tpu.memory_space<vmem>>, %arg3: memref<16x32xbf16, #tpu.memory_space<vmem>>, %arg4: memref<16x32xbf16, #tpu.memory_space<vmem>>, %arg5: memref<1x32xf32, #tpu.memory_space<vmem>>, %arg6: memref<1x32xf32, #tpu.memory_space<vmem>>, %arg7: memref<3xf32, #tpu.memory_space<smem>>, %arg8: memref<1x128xf32, #tpu.memory_space<vmem>>) attributes {dimension_semantics = [#tpu.dimension_semantics<parallel>], iteration_bounds = array<i64: 1>, scalar_prefetch = 0 : i64, scratch_operands = 0 : i64, tpu.core_type = #tpu.core_type<tc>, window_params = [{transform_indices = @transform_0, window_bounds = array<i64: 128, 16>}, {transform_indices = @transform_1, window_bounds = array<i64: 128, 16>}, {pipeline_mode = #tpu.pipeline_mode<synchronous>, transform_indices = @transform_2, window_bounds = array<i64: 16, 32>}, {pipeline_mode = #tpu.pipeline_mode<synchronous>, transform_indices = @transform_3, window_bounds = array<i64: 16, 32>}, {pipeline_mode = #tpu.pipeline_mode<synchronous>, transform_indices = @transform_4, window_bounds = array<i64: 1, 32>}, {pipeline_mode = #tpu.pipeline_mode<synchronous>, transform_indices = @transform_5, window_bounds = array<i64: 1, 32>}, {transform_indices = @transform_6, window_bounds = array<i64: 3>}, {transform_indices = @transform_7, window_bounds = array<i64: 1, 128>}]} {
    %c0 = arith.constant 0 : index
    %c0_0 = arith.constant 0 : index
    %0 = vector.load %arg1[%c0, %c0_0] : memref<128x16xf32, #tpu.memory_space<vmem>>, vector<128x16xf32>
    %1 = arith.truncf %0 : vector<128x16xf32> to vector<128x16xbf16>
    %c0_1 = arith.constant 0 : index
    %c0_2 = arith.constant 0 : index
    %2 = vector.load %arg3[%c0_1, %c0_2] : memref<16x32xbf16, #tpu.memory_space<vmem>>, vector<16x32xbf16>
    %cst = arith.constant dense<0.000000e+00> : vector<128x32xf32>
    %3 = tpu.matmul %1, %2, %cst {dimension_numbers = #tpu.dot_dimension_numbers<[1], [0], [0], [1], [0, 0, 1, 1], [], []>} : vector<128x16xbf16>, vector<16x32xbf16>, vector<128x32xf32> -> vector<128x32xf32>
    %c0_3 = arith.constant 0 : index
    %c0_4 = arith.constant 0 : index
    %4 = vector.load %arg2[%c0_3, %c0_4] : memref<128x16xf32, #tpu.memory_space<vmem>>, vector<128x16xf32>
    %5 = arith.truncf %4 : vector<128x16xf32> to vector<128x16xbf16>
    %c0_5 = arith.constant 0 : index
    %c0_6 = arith.constant 0 : index
    %6 = vector.load %arg4[%c0_5, %c0_6] : memref<16x32xbf16, #tpu.memory_space<vmem>>, vector<16x32xbf16>
    %cst_7 = arith.constant dense<0.000000e+00> : vector<128x32xf32>
    %7 = tpu.matmul %5, %6, %cst_7 {dimension_numbers = #tpu.dot_dimension_numbers<[1], [0], [0], [1], [0, 0, 1, 1], [], []>} : vector<128x16xbf16>, vector<16x32xbf16>, vector<128x32xf32> -> vector<128x32xf32>
    %8 = arith.addf %3, %7 : vector<128x32xf32>
    %c0_8 = arith.constant 0 : index
    %c0_9 = arith.constant 0 : index
    %9 = vector.load %arg5[%c0_8, %c0_9] : memref<1x32xf32, #tpu.memory_space<vmem>>, vector<1x32xf32>
    %10 = vector.broadcast %9 : vector<1x32xf32> to vector<128x32xf32>
    %11 = arith.addf %8, %10 : vector<128x32xf32>
    %12 = math.tanh %11 : vector<128x32xf32>
    %c0_10 = arith.constant 0 : index
    %c0_11 = arith.constant 0 : index
    %13 = vector.load %arg6[%c0_10, %c0_11] : memref<1x32xf32, #tpu.memory_space<vmem>>, vector<1x32xf32>
    %cst_12 = arith.constant dense<0.000000e+00> : vector<1x128xf32>
    %14 = tpu.matmul %13, %12, %cst_12 {dimension_numbers = #tpu.dot_dimension_numbers<[1], [1], [0], [0], [0, 0, 1, 0], [], []>} : vector<1x32xf32>, vector<128x32xf32>, vector<1x128xf32> -> vector<1x128xf32>
    %c0_13 = arith.constant 0 : index
    %15 = memref.load %arg7[%c0_13] : memref<3xf32, #tpu.memory_space<smem>>
    %c1 = arith.constant 1 : index
    %16 = memref.load %arg7[%c1] : memref<3xf32, #tpu.memory_space<smem>>
    %c2 = arith.constant 2 : index
    %17 = memref.load %arg7[%c2] : memref<3xf32, #tpu.memory_space<smem>>
    %18 = vector.broadcast %15 : f32 to vector<1x128xf32>
    %19 = arith.addf %14, %18 : vector<1x128xf32>
    %20 = math.tanh %19 : vector<1x128xf32>
    %21 = vector.broadcast %16 : f32 to vector<1x128xf32>
    %22 = arith.mulf %20, %21 : vector<1x128xf32>
    %23 = vector.broadcast %17 : f32 to vector<1x128xf32>
    %24 = arith.addf %22, %23 : vector<1x128xf32>
    %c0_14 = arith.constant 0 : index
    %c0_15 = arith.constant 0 : index
    %25 = vector.load %arg8[%c0_14, %c0_15] : memref<1x128xf32, #tpu.memory_space<vmem>>, vector<1x128xf32>
    tpu.vector_store %arg8[%c0_14, %c0_15], %24 {strides = array<i32>} : memref<1x128xf32, #tpu.memory_space<vmem>>, vector<1x128xf32>,
    return
  }
  func.func @transform_0(%arg0: i32) -> (i32, i32) {
    %c0_i32 = arith.constant 0 : i32
    %c0_i32_0 = arith.constant 0 : i32
    return %arg0, %c0_i32 : i32, i32
  }
  func.func @transform_1(%arg0: i32) -> (i32, i32) {
    %c0_i32 = arith.constant 0 : i32
    %c0_i32_0 = arith.constant 0 : i32
    return %arg0, %c0_i32 : i32, i32
  }
  func.func @transform_2(%arg0: i32) -> (i32, i32) {
    %c0_i32 = arith.constant 0 : i32
    %c0_i32_0 = arith.constant 0 : i32
    %c0_i32_1 = arith.constant 0 : i32
    return %c0_i32, %c0_i32_0 : i32, i32
  }
  func.func @transform_3(%arg0: i32) -> (i32, i32) {
    %c0_i32 = arith.constant 0 : i32
    %c0_i32_0 = arith.constant 0 : i32
    %c0_i32_1 = arith.constant 0 : i32
    return %c0_i32, %c0_i32_0 : i32, i32
  }
  func.func @transform_4(%arg0: i32) -> (i32, i32) {
    %c0_i32 = arith.constant 0 : i32
    %c0_i32_0 = arith.constant 0 : i32
    %c0_i32_1 = arith.constant 0 : i32
    return %c0_i32, %c0_i32_0 : i32, i32
  }
  func.func @transform_5(%arg0: i32) -> (i32, i32) {
    %c0_i32 = arith.constant 0 : i32
    %c0_i32_0 = arith.constant 0 : i32
    %c0_i32_1 = arith.constant 0 : i32
    return %c0_i32, %c0_i32_0 : i32, i32
  }
  func.func @transform_6(%arg0: i32) -> i32 {
    %c0_i32 = arith.constant 0 : i32
    %c0_i32_0 = arith.constant 0 : i32
    return %c0_i32 : i32
  }
  func.func @transform_7(%arg0: i32) -> (i32, i32) {
    %c0_i32 = arith.constant 0 : i32
    %c0_i32_0 = arith.constant 0 : i32
    return %c0_i32, %arg0 : i32, i32
  }
}

</mosaic_0001>

<bundles_post_ra>
// kernel: tpu_custom_call.1
= control target key start
LH: loop header
LB: loop body
LE: loop exit
PB: predicated region body
PF: predicated region fallthrough
CT: control target
= control target key end

     0   :  { %12 = vsyncpa [#allocation4], 0  ;;  %s1005_s0 = inlined_call_operand.vmem [shape: f32[128,16], index: 0, kind: input, shape index: {}]   ;;  %s1006_s1 = inlined_call_operand.vmem [shape: f32[128,16], index: 1, kind: input, shape index: {}]   ;;  %s1007_s2 = inlined_call_operand.vmem [shape: bf16[16,32], index: 2, kind: input, shape index: {}]   ;;  %s1008_s3 = inlined_call_operand.vmem [shape: bf16[16,32], index: 3, kind: input, shape index: {}]   ;;  %s1009_s4 = inlined_call_operand.vmem [shape: f32[1,32], index: 4, kind: input, shape index: {}]   ;;  %s1010_s5 = inlined_call_operand.vmem [shape: f32[1,32], index: 5, kind: input, shape index: {}]   ;;  %s1011_s6 = inlined_call_operand.vmem [shape: f32[3], index: 6, kind: input, shape index: {}]   ;;  %s1012_s7 = inlined_call_operand.hbm [shape: f32[1,128], index: 7, kind: output, shape index: {}]  }
   0x1   :  { %13 = vsyncpa [#allocation3], 0  ;;  %s32_s26 = sshll.u32 %s1011_s6, 4  ;;  %s33_s26 = int_to_ptr.vmem [resolvable:$true] %s32_s26 }
   0x2   :  { %s719_s27 = scalar_lea.vmem %s33_s26, 16  ;;  %p724_p1 = scmp.lt.s32.totalorder %s33_s26, %s33_s26 }
   0x3   :  { %p720_p0 = scmp.ne.s32.totalorder %s33_s26, %s719_s27  ;;  %p725_p2 = scmp.lt.s32.totalorder %s719_s27, %s719_s27 }
   0x5   :  { %p726_p3 = por %p725_p2, %p724_p1 }
   0x7   :  { %p727_p4 = pnand %p726_p3, %p720_p0 }
   0x9   :  { %730 = shalt.err (!%p727_p4)
}
   0xa   :  { %s755_s28 = smov [#allocation2]  }
   0xb   :  { %35 = dma.vmem_to_smem %s33_s26, 16, %s755_s28, [#allocation4]  }
   0xc   :  { %751 = dma.done.wait [#allocation4], 16  }
   0xd   :  { %752 = vsyncadd [#allocation4], 4294967280 }
   0xe   :  { %39 = sfence }
   0xf   :  { %v683_v0 = vld [vmem:[%s1008_s3] sm:$0xff]   ;;  %v68_v2 = vld [vmem:[%s1006_s1 + $0x8] sm:$0xff]  ;;  %vm99_vm0 = vcmask 130048   ;;  %v69_v3 = vld [vmem:[%s1006_s1 + $0x10] sm:$0xff]  ;;  %v756_v50 = vmov 0.0   ;;  %vm757_vm1 = vmmov 0  }
  0x10   :  { %v67_v1 = vld [vmem:[%s1006_s1] sm:$0xff]  ;;  %608 = vmatprep.subr.bf16.mxu1 %v683_v0  ;;  %v70_v5 = vld [vmem:[%s1006_s1 + $0x18] sm:$0xff]  ;;  %v72_v9 = vld [vmem:[%s1006_s1 + $0x28] sm:$0xff]  ;;  %644 = vmatprep.subr.mxu0 %v756_v50  ;;  %vm392_vm2 = vcmask 261120   ;;  %s554_s21 = sld [smem:[#allocation2 + $0x1]]  ;;  %s758_s22 = smov [#allocation5]  }
  0x11   :  { %v83_v4 = vpack.c.bf16 %v68_v2, %v67_v1  ;;  %609 = vmatpush3.bf16.msra.mxu1 %v683_v0  ;;  %v84_v6 = vpack.c.bf16 %v70_v5, %v69_v3  ;;  %v684_v7 = vld [vmem:[%s1007_s2] sm:$0xff]   ;;  %v73_v11 = vld [vmem:[%s1006_s1 + $0x30] sm:$0xff]  ;;  %v74_v12 = vld [vmem:[%s1006_s1 + $0x38] sm:$0xff]  ;;  %676 = vmatprep.mubr.msk.f32.mxu0 %vm757_vm1, %v756_v50  ;;  %s555_s2 = sld [smem:[#allocation2 + $0x2]]  ;;  %s526_s23 = sshll.u32 %s758_s22, 4  ;;  %s527_s23 = int_to_ptr.vmem [resolvable:$true] %s526_s23 }
  0x12   :  { %v71_v8 = vld [vmem:[%s1006_s1 + $0x20] sm:$0xff]  ;;  %626 = vmatprep.subr.bf16.mxu1 %v684_v7  ;;  %v76_v14 = vld [vmem:[%s1006_s1 + $0x48] sm:$0xff]  ;;  %v86_v15 = vpack.c.bf16 %v74_v12, %v73_v11  ;;  %v77_v17 = vld [vmem:[%s1006_s1 + $0x50] sm:$0xff]  ;;  %s735_s24 = scalar_lea.vmem %s527_s23, 32  ;;  %p736_p6 = scmp.lt.s32.totalorder %s527_s23, %s527_s23 }
  0x13   :  { %610 = vmatprep.mubr.msk.bf16.mxu1 %vm99_vm0, %v83_v4  ;;  %v85_v10 = vpack.c.bf16 %v72_v9, %v71_v8  ;;  %v75_v13 = vld [vmem:[%s1006_s1 + $0x40] sm:$0xff]  ;;  %v78_v18 = vld [vmem:[%s1006_s1 + $0x58] sm:$0xff]  ;;  %v80_v20 = vld [vmem:[%s1006_s1 + $0x68] sm:$0xff] }
  0x14   :  { %611 = vmatmul.mubr.msk.bf16.vlgmr.msra.gmra.mxu1 %vm99_vm0, %v84_v6  ;;  %v87_v16 = vpack.c.bf16 %v76_v14, %v75_v13  ;;  %v79_v19 = vld [vmem:[%s1006_s1 + $0x60] sm:$0xff]  ;;  %v88_v21 = vpack.c.bf16 %v78_v18, %v77_v17  ;;  %v81_v23 = vld [vmem:[%s1006_s1 + $0x70] sm:$0xff]  ;;  %v82_v24 = vld [vmem:[%s1006_s1 + $0x78] sm:$0xff]  ;;  %s388_s1 = sld [smem:[#allocation2]] }
  0x15   :  { %627 = vmatpush3.bf16.msra.mxu1 %v684_v7  ;;  %614 = vmatprep.mubr.msk.bf16.mxu1 %vm99_vm0, %v85_v10  ;;  %v89_v22 = vpack.c.bf16 %v80_v20, %v79_v19  ;;  %v41_v25 = vld [vmem:[%s1005_s0] sm:$0xff]  ;;  %v42_v26 = vld [vmem:[%s1005_s0 + $0x8] sm:$0xff]  ;;  %v90_v27 = vpack.c.bf16 %v82_v24, %v81_v23  ;;  %v43_v29 = vld [vmem:[%s1005_s0 + $0x10] sm:$0xff] }
  0x16   :  { %v57_v28 = vpack.c.bf16 %v42_v26, %v41_v25  ;;  %v44_v30 = vld [vmem:[%s1005_s0 + $0x18] sm:$0xff]  ;;  %v45_v31 = vld [vmem:[%s1005_s0 + $0x20] sm:$0xff]  ;;  %v46_v32 = vld [vmem:[%s1005_s0 + $0x28] sm:$0xff] }
  0x17   :  { %v58_v33 = vpack.c.bf16 %v44_v30, %v43_v29  ;;  %v59_v34 = vpack.c.bf16 %v46_v32, %v45_v31  ;;  %v47_v35 = vld [vmem:[%s1005_s0 + $0x30] sm:$0xff]  ;;  %v48_v36 = vld [vmem:[%s1005_s0 + $0x38] sm:$0xff]  ;;  %v49_v37 = vld [vmem:[%s1005_s0 + $0x40] sm:$0xff] }
  0x18   :  { %v50_v38 = vld [vmem:[%s1005_s0 + $0x48] sm:$0xff]  ;;  %v60_v39 = vpack.c.bf16 %v48_v36, %v47_v35  ;;  %v51_v41 = vld [vmem:[%s1005_s0 + $0x50] sm:$0xff]  ;;  %v52_v42 = vld [vmem:[%s1005_s0 + $0x58] sm:$0xff] }
  0x19   :  { %v61_v40 = vpack.c.bf16 %v50_v38, %v49_v37  ;;  %v53_v43 = vld [vmem:[%s1005_s0 + $0x60] sm:$0xff]  ;;  %v54_v44 = vld [vmem:[%s1005_s0 + $0x68] sm:$0xff]  ;;  %v62_v45 = vpack.c.bf16 %v52_v42, %v51_v41  ;;  %v55_v47 = vld [vmem:[%s1005_s0 + $0x70] sm:$0xff] }
  0x1a   :  { %v63_v46 = vpack.c.bf16 %v54_v44, %v53_v43  ;;  %v56_v48 = vld [vmem:[%s1005_s0 + $0x78] sm:$0xff]  ;;  %v941_v24 = vld [vmem:[%s1009_s4] ss:$0 sm:$0xff] }
  0x1b   :  { %v64_v49 = vpack.c.bf16 %v56_v48, %v55_v47 }
  0x1c   :  { %615 = vmatmul.mubr.msk.bf16.gmra.mxu1 %vm99_vm0, %v86_v15 }
  0x1d   :  { %618 = vmatprep.mubr.msk.bf16.mxu1 %vm99_vm0, %v87_v16 }
  0x24   :  { %619 = vmatmul.mubr.msk.bf16.gmra.mxu1 %vm99_vm0, %v88_v21 }
  0x25   :  { %622 = vmatprep.mubr.msk.bf16.mxu1 %vm99_vm0, %v89_v22 }
  0x2c   :  { %623 = vmatmul.mubr.msk.bf16.gmra.mxu1 %vm99_vm0, %v90_v27 }
  0x2d   :  { %628 = vmatprep.mubr.msk.bf16.mxu1 %vm99_vm0, %v57_v28 }
  0x34   :  { %629 = vmatmul.mubr.msk.bf16.vlgmr.msra.gmra.mxu1 %vm99_vm0, %v58_v33 }
  0x35   :  { %632 = vmatprep.mubr.msk.bf16.mxu1 %vm99_vm0, %v59_v34 }
  0x3c   :  { %633 = vmatmul.mubr.msk.bf16.gmra.mxu1 %vm99_vm0, %v60_v39 }
  0x3d   :  { %636 = vmatprep.mubr.msk.bf16.mxu1 %vm99_vm0, %v61_v40 }
  0x44   :  { %637 = vmatmul.mubr.msk.bf16.gmra.mxu1 %vm99_vm0, %v62_v45 }
  0x45   :  { %640 = vmatprep.mubr.msk.bf16.mxu1 %vm99_vm0, %v63_v46 }
  0x4c   :  { %641 = vmatmul.mubr.msk.bf16.gmra.mxu1 %vm99_vm0, %v64_v49 }
  0xd4   :  { %v612_v51 = vpop.f32.mrf.mxu1 }
  0xd6   :  { %v158_v52 = vpop.f32.mrf.mxu1 }
  0xd8   :  { %v613_v53 = vpop.f32.mrf.mxu1 }
  0xda   :  { %v161_v54 = vpop.f32.mrf.mxu1 }
  0xdc   :  { %v921_v55 = vpop.f32.mrf.mxu1 }
  0xde   :  { %v923_v56 = vpop.f32.mrf.mxu1 }
  0xe0   :  { %v925_v57 = vpop.f32.mrf.mxu1 }
  0xe2   :  { %v928_v58 = vpop.f32.mrf.mxu1 }
  0xe4   :  { %v620_v59 = vpop.f32.mrf.mxu1 }
  0xe6   :  { %v190_v60 = vpop.f32.mrf.mxu1 }
  0xe8   :  { %v621_v61 = vpop.f32.mrf.mxu1 }
  0xea   :  { %v193_v62 = vpop.f32.mrf.mxu1 }
  0xec   :  { %v624_v63 = vpop.f32.mrf.mxu1 }
  0xee   :  { %v206_v0 = vpop.f32.mrf.mxu1 }
  0xf0   :  { %v625_v1 = vpop.f32.mrf.mxu1 }
  0xf2   :  { %v209_v2 = vpop.f32.mrf.mxu1 }
  0xf4   :  { %v630_v3 = vpop.f32.mrf.mxu1 }
  0xf5   :  { %v930_v4 = vadd.f32 %v630_v3, %v612_v51 }
  0xf6   :  { %v285_v5 = vpop.f32.mrf.mxu1 }
  0xf7   :  { %v932_v6 = vadd.f32 %v285_v5, %v158_v52  ;;  %v387_v5 = vld [vmem:[%s1010_s5] sm:$0x1]  ;;  %s731_s5 = scalar_lea.vmem %s527_s23, 16 }
  0xf8   :  { %v631_v7 = vpop.f32.mrf.mxu1  ;;  %p732_p5 = scmp.ne.s32.totalorder %s527_s23, %s731_s5  ;;  %p737_p7 = scmp.lt.s32.totalorder %s735_s24, %s731_s5 }
  0xf9   :  { %v934_v8 = vadd.f32 %v631_v7, %v613_v53 }
  0xfa   :  { %v288_v9 = vpop.f32.mrf.mxu1  ;;  %p738_p8 = por %p737_p7, %p736_p6 }
  0xfb   :  { %v936_v10 = vadd.f32 %v288_v9, %v161_v54 }
  0xfc   :  { %v634_v11 = vpop.f32.mrf.mxu1  ;;  %p739_p9 = pnand %p738_p8, %p732_p5 }
  0xfd   :  { %v310_v45 = vadd.f32 %v634_v11, %v921_v55 }
  0xfe   :  { %v301_v12 = vpop.f32.mrf.mxu1 }
  0xff   :  { %v361_v48 = vadd.f32 %v941_v24, %v310_v45  ;;  %v302_v52 = vadd.f32 %v301_v12, %v923_v56 }
 0x100   :  { %v635_v13 = vpop.f32.mrf.mxu1 }
 0x101   :  { %v313_v42 = vadd.f32 %v635_v13, %v925_v57  ;;  %v359_v55 = vadd.f32 %v941_v24, %v302_v52 }
 0x102   :  { %v304_v14 = vpop.f32.mrf.mxu1 }
 0x103   :  { %v362_v46 = vadd.f32 %v941_v24, %v313_v42  ;;  %v305_v49 = vadd.f32 %v304_v14, %v928_v58  ;;  %v358_v58 = vadd.f32 %v941_v24, %v934_v8 }
 0x104   :  { %v638_v15 = vpop.f32.mrf.mxu1 }
 0x105   :  { %v326_v33 = vadd.f32 %v638_v15, %v620_v59  ;;  %v360_v53 = vadd.f32 %v941_v24, %v305_v49  ;;  %v357_v59 = vadd.f32 %v941_v24, %v930_v4 }
 0x106   :  { %v317_v16 = vpop.f32.mrf.mxu1 }
 0x107   :  { %v365_v36 = vadd.f32 %v941_v24, %v326_v33  ;;  %v318_v39 = vadd.f32 %v317_v16, %v190_v60 }
 0x108   :  { %v639_v17 = vpop.f32.mrf.mxu1 }
 0x109   :  { %v329_v31 = vadd.f32 %v639_v17, %v621_v61  ;;  %v363_v43 = vadd.f32 %v941_v24, %v318_v39  ;;  %v356_v61 = vadd.f32 %v941_v24, %v936_v10  ;;  %v515_v10 = vstv %s554_s21 }
 0x10a   :  { %v320_v18 = vpop.f32.mrf.mxu1 }
 0x10b   :  { %v366_v34 = vadd.f32 %v941_v24, %v329_v31  ;;  %v321_v37 = vadd.f32 %v320_v18, %v193_v62 }
 0x10c   :  { %v642_v19 = vpop.f32.mrf.mxu1 }
 0x10d   :  { %v342_v22 = vadd.f32 %v642_v19, %v624_v63  ;;  %v364_v40 = vadd.f32 %v941_v24, %v321_v37  ;;  %v355_v63 = vadd.f32 %v941_v24, %v932_v6  ;;  %v391_v6 = vstv %s388_s1 }
 0x10e   :  { %v333_v20 = vpop.f32.mrf.mxu1 }
 0x10f   :  { %v369_v27 = vadd.f32 %v941_v24, %v342_v22  ;;  %v334_v29 = vadd.f32 %v333_v20, %v206_v0 }
 0x110   :  { %v643_v21 = vpop.f32.mrf.mxu1 }
 0x111   :  { %v345_v23 = vadd.f32 %v643_v21, %v625_v1  ;;  %v367_v32 = vadd.f32 %v941_v24, %v334_v29 }
 0x112   :  { %v336_v25 = vpop.f32.mrf.mxu1 }
 0x113   :  { %v370_v26 = vadd.f32 %v941_v24, %v345_v23  ;;  %v337_v28 = vadd.f32 %v336_v25, %v209_v2 }
 0x115   :  { %685 = vtanh.f32 %v370_v26  ;;  %v368_v30 = vadd.f32 %v941_v24, %v337_v28 }
 0x116   :  { %687 = vtanh.f32 %v369_v27 }
 0x117   :  { %689 = vtanh.f32 %v368_v30 }
 0x118   :  { %691 = vtanh.f32 %v367_v32 }
 0x119   :  { %693 = vtanh.f32 %v366_v34 }
 0x11a   :  { %695 = vtanh.f32 %v365_v36 }
 0x11b   :  { %697 = vtanh.f32 %v364_v40 }
 0x11c   :  { %699 = vtanh.f32 %v363_v43 }
 0x11d   :  { %701 = vtanh.f32 %v362_v46 }
 0x11e   :  { %703 = vtanh.f32 %v361_v48 }
 0x11f   :  { %705 = vtanh.f32 %v360_v53 }
 0x120   :  { %707 = vtanh.f32 %v359_v55 }
 0x121   :  { %709 = vtanh.f32 %v358_v58 }
 0x122   :  { %v686_v35 = vpop.eup %685  ;;  %711 = vtanh.f32 %v357_v59 }
 0x123   :  { %645 = vmatpush3.xpose.msk.msra.mxu0 %vm392_vm2, %v686_v35  ;;  %v688_v38 = vpop.eup %687  ;;  %713 = vtanh.f32 %v356_v61 }
 0x124   :  { %646 = vmatprep.subr.mxu0 %v756_v50  ;;  %v690_v41 = vpop.eup %689  ;;  %715 = vtanh.f32 %v355_v63 }
 0x125   :  { %v692_v44 = vpop.eup %691 }
 0x126   :  { %v694_v47 = vpop.eup %693 }
 0x127   :  { %647 = vmatpush3.xpose.msk.msra.mxu0 %vm392_vm2, %v688_v38  ;;  %v696_v51 = vpop.eup %695 }
 0x128   :  { %648 = vmatprep.subr.mxu0 %v756_v50  ;;  %v698_v54 = vpop.eup %697 }
 0x129   :  { %v700_v57 = vpop.eup %699 }
 0x12a   :  { %v702_v56 = vpop.eup %701 }
 0x12b   :  { %649 = vmatpush3.xpose.msk.msra.mxu0 %vm392_vm2, %v690_v41  ;;  %v704_v60 = vpop.eup %703 }
 0x12c   :  { %650 = vmatprep.subr.mxu0 %v756_v50  ;;  %v706_v62 = vpop.eup %705 }
 0x12d   :  { %v708_v0 = vpop.eup %707 }
 0x12e   :  { %v710_v1 = vpop.eup %709 }
 0x12f   :  { %651 = vmatpush3.xpose.msk.msra.mxu0 %vm392_vm2, %v692_v44  ;;  %v712_v2 = vpop.eup %711 }
 0x130   :  { %652 = vmatprep.subr.mxu0 %v756_v50  ;;  %v714_v3 = vpop.eup %713 }
 0x131   :  { %v716_v4 = vpop.eup %715 }
 0x133   :  { %653 = vmatpush3.xpose.msk.msra.mxu0 %vm392_vm2, %v694_v47 }
 0x134   :  { %654 = vmatprep.subr.mxu0 %v756_v50 }
 0x137   :  { %655 = vmatpush3.xpose.msk.msra.mxu0 %vm392_vm2, %v696_v51 }
 0x138   :  { %656 = vmatprep.subr.mxu0 %v756_v50 }
 0x13b   :  { %657 = vmatpush3.xpose.msk.msra.mxu0 %vm392_vm2, %v698_v54 }
 0x13c   :  { %658 = vmatprep.subr.mxu0 %v756_v50 }
 0x13f   :  { %659 = vmatpush3.xpose.msk.msra.mxu0 %vm392_vm2, %v700_v57 }
 0x140   :  { %660 = vmatprep.subr.mxu0 %v756_v50 }
 0x143   :  { %661 = vmatpush3.xpose.msk.msra.mxu0 %vm392_vm2, %v702_v56 }
 0x144   :  { %662 = vmatprep.subr.mxu0 %v756_v50 }
 0x147   :  { %663 = vmatpush3.xpose.msk.msra.mxu0 %vm392_vm2, %v704_v60 }
 0x148   :  { %664 = vmatprep.subr.mxu0 %v756_v50 }
 0x14b   :  { %665 = vmatpush3.xpose.msk.msra.mxu0 %vm392_vm2, %v706_v62 }
 0x14c   :  { %666 = vmatprep.subr.mxu0 %v756_v50 }
 0x14f   :  { %667 = vmatpush3.xpose.msk.msra.mxu0 %vm392_vm2, %v708_v0 }
 0x150   :  { %668 = vmatprep.subr.mxu0 %v756_v50 }
 0x153   :  { %669 = vmatpush3.xpose.msk.msra.mxu0 %vm392_vm2, %v710_v1 }
 0x154   :  { %670 = vmatprep.subr.mxu0 %v756_v50 }
 0x157   :  { %671 = vmatpush3.xpose.msk.msra.mxu0 %vm392_vm2, %v712_v2 }
 0x158   :  { %672 = vmatprep.subr.mxu0 %v756_v50 }
 0x15b   :  { %673 = vmatpush3.xpose.msk.msra.mxu0 %vm392_vm2, %v714_v3 }
 0x15c   :  { %674 = vmatprep.subr.mxu0 %v756_v50  ;;  %v517_v50 = vstv %s555_s2 }
 0x15f   :  { %675 = vmatpush3.xpose.msk.msra.mxu0 %vm392_vm2, %v716_v4 }
 0x162   :  { %677 = vmatmul.mubr.msk.f32.vlgmr.msra.gmra.mxu0 %vm392_vm2, %v387_v5 }
 0x222   :  { %v510_v7 = vpop.f32.mrf.mxu0 }
 0x223   :  { %v511_v8 = vadd.f32 %v510_v7, %v391_v6 }
 0x224   :  { %v678_v9 = vpop.f32.mrf.mxu0 }
 0x225   :  { %717 = vtanh.f32 %v511_v8 }
 0x232   :  { %v718_v11 = vpop.eup %717 }
 0x233   :  { %v516_v12 = vmul.f32 %v718_v11, %v515_v10 }
 0x235   :  { %v518_v13 = vadd.f32 %v517_v50, %v516_v12 }
 0x237   :  { %519 = vst [vmem:[#allocation5] sm:$0x1] %v518_v13 }
 0x238   :  { %742 = shalt.err (!%p739_p9)
}
 0x239   :  { %529 = dma.vmem_to_hbm [thread:$0]  %s527_s23, 16, %s1012_s7, [#allocation3]  }
 0x23a   :  { %753 = dma.done.wait [#allocation3], 16  }
 0x23b   :  { %754 = vsyncadd [#allocation3], 4294967280 }
 0x23c   :  { %533 = vsyncpa [#allocation3], 1 }
 0x23d   :  { %534 = vsyncpa [#allocation4], 1 }

</bundles_post_ra>
